<compile_context>
chip_gen: v5e
topology: v5e:2x2
jax: 0.10.0
libtpu: 0.0.40
codegen_flags: <defaults>
</compile_context>

<pallas_src>
import functools

import jax
import jax.numpy as jnp
from jax import lax
from jax.experimental import pallas as pl
from jax.experimental.pallas import tpu as pltpu

_LANES = 128        # lane (fast) axis width of every tile
_CHUNK_ROWS = 32    # sublane rows per inner-loop iteration (4 vregs per value)


def _round_up(a: int, b: int) -> int:
    return ((a + b - 1) // b) * b


def _hermite_kernel(x_ref, o_ref, *, max_order: int, chunk_rows: int):
    """One grid step: H_0..H_max_order for a (block_rows, 128) tile of x.

    x_ref : (block_rows, LANES)        float32 VMEM
    o_ref : (P, block_rows, LANES)     float32 VMEM, P = max_order + 1
    """
    block_rows = x_ref.shape[0]
    n_chunks = block_rows // chunk_rows

    def body(c, carry):
        r = pl.multiple_of(c * chunk_rows, chunk_rows)
        x = x_ref[pl.ds(r, chunk_rows), :]              # (chunk_rows, 128) full vregs
        h_prev = jnp.ones_like(x)                       # H_0
        o_ref[0, pl.ds(r, chunk_rows), :] = h_prev
        if max_order >= 1:
            h_cur = 2.0 * x                             # H_1
            o_ref[1, pl.ds(r, chunk_rows), :] = h_cur
            # static unrolled recurrence: H_{n+1} = 2x H_n - 2n H_{n-1}
            for nn in range(1, max_order):
                h_next = 2.0 * x * h_cur - (2.0 * nn) * h_prev
                o_ref[nn + 1, pl.ds(r, chunk_rows), :] = h_next
                h_prev, h_cur = h_cur, h_next
        return carry

    lax.fori_loop(0, n_chunks, body, 0)


def hermite_features_pn(x: jax.Array, max_order: int, *,
                        target_step_bytes: int = 3 << 20) -> jax.Array:
    """Lane-dense Hermite features: returns (max_order + 1, N) float32.

    Prefer this layout when the downstream consumer can contract / reduce over
    it directly — it avoids the (N, P) relayout pass entirely.
    """
    if x.ndim != 1:
        raise ValueError(f"Expected x to have 1 dimension, got shape {x.shape}")

    n = x.shape[0]
    p = max_order + 1
    x = x.astype(jnp.float32)

    # --- tiling: (rows, 128) with block_rows rows per grid step -------------
    rows_needed = max(1, pl.cdiv(n, _LANES))
    # rows per step so each step moves ~target_step_bytes of HBM traffic
    # ((1 + P) float32 values per element).
    rows_budget = (target_step_bytes // ((1 + p) * 4 * _LANES)) // _CHUNK_ROWS * _CHUNK_ROWS
    rows_budget = max(_CHUNK_ROWS, rows_budget)
    num_steps = pl.cdiv(rows_needed, rows_budget)
    block_rows = _round_up(pl.cdiv(rows_needed, num_steps), _CHUNK_ROWS)
    r_pad = num_steps * block_rows
    n_pad = r_pad * _LANES

    x2d = jnp.pad(x, (0, n_pad - n)).reshape(r_pad, _LANES)

    out_3d = pl.pallas_call(
        functools.partial(_hermite_kernel, max_order=max_order,
                          chunk_rows=_CHUNK_ROWS),
        out_shape=jax.ShapeDtypeStruct((p, r_pad, _LANES), jnp.float32),
        grid_spec=pl.GridSpec(
            grid=(num_steps,),
            in_specs=[pl.BlockSpec((block_rows, _LANES), lambda i: (i, 0))],
            out_specs=pl.BlockSpec((p, block_rows, _LANES), lambda i: (0, i, 0)),
        ),
        compiler_params=pltpu.CompilerParams(
            dimension_semantics=("parallel",),
        ),
    )(x2d)

    # (P, R_pad, 128) -> (P, N); reshape is layout-free, slice drops padding.
    return out_3d.reshape(p, n_pad)[:, :n]


def hermite_layer(x: jax.Array, max_order: int, **kwargs) -> jax.Array:
    """Apply Hermite polynomials H_0..H_max_order elementwise to 1-D x.

    Returns (N, max_order + 1) float32, matching torch.stack(..., dim=-1).
    The final transpose is the only relayout pass; use hermite_features_pn
    to consume the lane-dense (P, N) layout directly and skip it.
    """
    return hermite_features_pn(x, max_order, **kwargs).T


def _hermite_reference(x: jax.Array, max_order: int) -> jax.Array:
    """Pure-JAX reference of the PyTorch forward."""
    x = x.astype(jnp.float32)
    feats = [jnp.ones_like(x)]
    if max_order >= 1:
        feats.append(2.0 * x)
        for nn in range(1, max_order):
            feats.append(2.0 * x * feats[-1] - 2.0 * nn * feats[-2])
    return jnp.stack(feats[: max_order + 1], axis=-1)


if __name__ == "__main__":
    max_order = 3
    key = jax.random.PRNGKey(0)
    # Small 1-D batch of values, consistent with the module's 1-D input contract.
    x = jax.random.normal(key, (16,), dtype=jnp.float32)

    out = jax.block_until_ready(hermite_layer(x, max_order))
    ref = _hermite_reference(x, max_order)
    assert out.shape == (16, max_order + 1), out.shape
    assert jnp.allclose(out, ref, atol=1e-5, rtol=1e-5), (out, ref)

    # Sanity check against the documented example values (physicists' Hermite):
    ex = jax.block_until_ready(
        hermite_layer(jnp.array([0.0, 1.0, 2.0], dtype=jnp.float32), 3))
    assert jnp.allclose(ex[:, 0], jnp.array([1.0, 1.0, 1.0]))
    assert jnp.allclose(ex[:, 1], jnp.array([0.0, 2.0, 4.0]))
    assert jnp.allclose(ex[:, 2], jnp.array([-2.0, 2.0, 14.0]))

    # Exercise a multi-step grid (forced small step size) to cover padding,
    # chunked inner loop and block boundaries.
    x_big = jax.random.normal(jax.random.PRNGKey(1), (10_000,), dtype=jnp.float32)
    out_big = jax.block_until_ready(
        hermite_layer(x_big, 5, target_step_bytes=64 * 1024))
    ref_big = _hermite_reference(x_big, 5)
    assert out_big.shape == (10_000, 6), out_big.shape
    assert jnp.allclose(out_big, ref_big, atol=1e-3, rtol=1e-5)

    print("KERNEL_OK")
</pallas_src>

<mosaic_0001>
module attributes {stable_mosaic.version = 11 : i64} {
  func.func @_hermite_kernel(%arg0: i32, %arg1: memref<32x128xf32, #tpu.memory_space<vmem>>, %arg2: memref<4x32x128xf32, #tpu.memory_space<vmem>>) attributes {dimension_semantics = [#tpu.dimension_semantics<parallel>], iteration_bounds = array<i64: 1>, scalar_prefetch = 0 : i64, scratch_operands = 0 : i64, tpu.core_type = #tpu.core_type<tc>, window_params = [{transform_indices = @transform_0, window_bounds = array<i64: 32, 128>}, {transform_indices = @transform_1, window_bounds = array<i64: 4, 32, 128>}]} {
    %c0_i32 = arith.constant 0 : i32
    %c32_i32 = arith.constant 32 : i32
    %0 = arith.muli %c0_i32, %c32_i32 : i32
    %1 = tpu.assume_multiple %0, 32 : i32
    %2 = arith.index_cast %1 : i32 to index
    %c0 = arith.constant 0 : index
    %3 = vector.load %arg1[%2, %c0] : memref<32x128xf32, #tpu.memory_space<vmem>>, vector<32x128xf32>
    %cst = arith.constant 1.000000e+00 : f32
    %4 = vector.broadcast %cst : f32 to vector<32x128xf32>
    %c0_0 = arith.constant 0 : index
    %5 = arith.index_cast %1 : i32 to index
    %c0_1 = arith.constant 0 : index
    %6 = vector.load %arg2[%c0_0, %5, %c0_1] : memref<4x32x128xf32, #tpu.memory_space<vmem>>, vector<1x32x128xf32>
    %7 = vector.shape_cast %6 : vector<1x32x128xf32> to vector<32x128xf32>
    %8 = vector.shape_cast %4 : vector<32x128xf32> to vector<1x32x128xf32>
    tpu.vector_store %arg2[%c0_0, %5, %c0_1], %8 {strides = array<i32>} : memref<4x32x128xf32, #tpu.memory_space<vmem>>, vector<1x32x128xf32>,
    %cst_2 = arith.constant 2.000000e+00 : f32
    %9 = vector.broadcast %cst_2 : f32 to vector<32x128xf32>
    %10 = arith.mulf %9, %3 : vector<32x128xf32>
    %c1 = arith.constant 1 : index
    %11 = arith.index_cast %1 : i32 to index
    %c0_3 = arith.constant 0 : index
    %12 = vector.load %arg2[%c1, %11, %c0_3] : memref<4x32x128xf32, #tpu.memory_space<vmem>>, vector<1x32x128xf32>
    %13 = vector.shape_cast %12 : vector<1x32x128xf32> to vector<32x128xf32>
    %14 = vector.shape_cast %10 : vector<32x128xf32> to vector<1x32x128xf32>
    tpu.vector_store %arg2[%c1, %11, %c0_3], %14 {strides = array<i32>} : memref<4x32x128xf32, #tpu.memory_space<vmem>>, vector<1x32x128xf32>,
    %cst_4 = arith.constant 2.000000e+00 : f32
    %15 = vector.broadcast %cst_4 : f32 to vector<32x128xf32>
    %16 = arith.mulf %15, %3 : vector<32x128xf32>
    %17 = arith.mulf %16, %10 : vector<32x128xf32>
    %cst_5 = arith.constant 2.000000e+00 : f32
    %18 = vector.broadcast %cst_5 : f32 to vector<32x128xf32>
    %19 = arith.mulf %18, %4 : vector<32x128xf32>
    %20 = arith.subf %17, %19 : vector<32x128xf32>
    %c2 = arith.constant 2 : index
    %21 = arith.index_cast %1 : i32 to index
    %c0_6 = arith.constant 0 : index
    %22 = vector.load %arg2[%c2, %21, %c0_6] : memref<4x32x128xf32, #tpu.memory_space<vmem>>, vector<1x32x128xf32>
    %23 = vector.shape_cast %22 : vector<1x32x128xf32> to vector<32x128xf32>
    %24 = vector.shape_cast %20 : vector<32x128xf32> to vector<1x32x128xf32>
    tpu.vector_store %arg2[%c2, %21, %c0_6], %24 {strides = array<i32>} : memref<4x32x128xf32, #tpu.memory_space<vmem>>, vector<1x32x128xf32>,
    %cst_7 = arith.constant 2.000000e+00 : f32
    %25 = vector.broadcast %cst_7 : f32 to vector<32x128xf32>
    %26 = arith.mulf %25, %3 : vector<32x128xf32>
    %27 = arith.mulf %26, %20 : vector<32x128xf32>
    %cst_8 = arith.constant 4.000000e+00 : f32
    %28 = vector.broadcast %cst_8 : f32 to vector<32x128xf32>
    %29 = arith.mulf %28, %10 : vector<32x128xf32>
    %30 = arith.subf %27, %29 : vector<32x128xf32>
    %c3 = arith.constant 3 : index
    %31 = arith.index_cast %1 : i32 to index
    %c0_9 = arith.constant 0 : index
    %32 = vector.load %arg2[%c3, %31, %c0_9] : memref<4x32x128xf32, #tpu.memory_space<vmem>>, vector<1x32x128xf32>
    %33 = vector.shape_cast %32 : vector<1x32x128xf32> to vector<32x128xf32>
    %34 = vector.shape_cast %30 : vector<32x128xf32> to vector<1x32x128xf32>
    tpu.vector_store %arg2[%c3, %31, %c0_9], %34 {strides = array<i32>} : memref<4x32x128xf32, #tpu.memory_space<vmem>>, vector<1x32x128xf32>,
    %c1_i32 = arith.constant 1 : i32
    return
  }
  func.func @transform_0(%arg0: i32) -> (i32, i32) {
    %c0_i32 = arith.constant 0 : i32
    %c0_i32_0 = arith.constant 0 : i32
    return %arg0, %c0_i32 : i32, i32
  }
  func.func @transform_1(%arg0: i32) -> (i32, i32, i32) {
    %c0_i32 = arith.constant 0 : i32
    %c0_i32_0 = arith.constant 0 : i32
    %c0_i32_1 = arith.constant 0 : i32
    return %c0_i32, %arg0, %c0_i32_0 : i32, i32, i32
  }
}

</mosaic_0001>

<bundles_post_ra>
// kernel: tpu_custom_call.1
= control target key start
LH: loop header
LB: loop body
LE: loop exit
PB: predicated region body
PF: predicated region fallthrough
CT: control target
= control target key end

     0   :  { %6 = vsyncpa [#allocation3], 0  ;;  %s185_s0 = inlined_call_operand.hbm [shape: f32[32,128], index: 0, kind: input, shape index: {}]   ;;  %s186_s1 = inlined_call_operand.hbm [shape: f32[4,32,128], index: 1, kind: output, shape index: {}]  }
   0x1   :  { %7 = vsyncpa [#allocation4], 0  ;;  %s12_s8 = sshll.u32 %s185_s0, 4  ;;  %s158_s9 = smov [#allocation2]   ;;  %s13_s8 = int_to_ptr.hbm [resolvable:$true] %s12_s8 }
   0x2   :  { %s14_s10 = sshll.u32 %s158_s9, 4  ;;  %s159_s11 = smov 128   ;;  %s15_s10 = int_to_ptr.vmem [resolvable:$true] %s14_s10 }
   0x3   :  { %s160_s12 = smov 8  }
   0x4   :  { %20 = dma.hbm_to_vmem [thread:$0]  %s13_s8, 512, %s15_s10, [#allocation3], %s159_s11, %s159_s11, %s160_s12  }
   0x5   :  { %154 = dma.done.wait [#allocation3], 512  }
   0x6   :  { %155 = vsyncadd [#allocation3], 4294966784  ;;  %v161_v0 = vmov 1.0   ;;  %v25_v1 = vld [vmem:[#allocation2] sm:$0xff]  ;;  %v26_v2 = vld [vmem:[#allocation2 + $0x8] sm:$0xff]  ;;  %s162_s0 = smov [#allocation5]  }
   0x7   :  { %29 = vst [vmem:[#allocation5] sm:$0xff] %v161_v0  ;;  %v27_v3 = vld [vmem:[#allocation2 + $0x10] sm:$0xff]  ;;  %v33_v4 = vmul.f32 2.0, %v25_v1  ;;  %v34_v5 = vmul.f32 2.0, %v26_v2  ;;  %v28_v7 = vld [vmem:[#allocation2 + $0x18] sm:$0xff]  ;;  %s79_s13 = sshll.u32 %s162_s0, 4  ;;  %s80_s13 = int_to_ptr.vmem [resolvable:$true] %s79_s13 }
   0x8   :  { %30 = vst [vmem:[#allocation5 + $0x8] sm:$0xff] %v161_v0  ;;  %v35_v6 = vmul.f32 2.0, %v27_v3  ;;  %v36_v8 = vmul.f32 2.0, %v28_v7  ;;  %s81_s16 = sshll.u32 %s186_s1, 4  ;;  %s82_s16 = int_to_ptr.hbm [resolvable:$true] %s81_s16 }
   0x9   :  { %31 = vst [vmem:[#allocation5 + $0x10] sm:$0xff] %v161_v0  ;;  %v43_v9 = vmul.f32 %v33_v4, %v33_v4  ;;  %v44_v10 = vmul.f32 %v34_v5, %v34_v5  ;;  %v61_v13 = vmul.f32 4.0, %v33_v4  ;;  %v62_v14 = vmul.f32 4.0, %v34_v5 }
   0xa   :  { %32 = vst [vmem:[#allocation5 + $0x18] sm:$0xff] %v161_v0  ;;  %v45_v11 = vmul.f32 %v35_v6, %v35_v6  ;;  %v46_v12 = vmul.f32 %v36_v8, %v36_v8  ;;  %v63_v18 = vmul.f32 4.0, %v35_v6  ;;  %v64_v20 = vmul.f32 4.0, %v36_v8 }
   0xb   :  { %39 = vst [vmem:[#allocation5 + $0x20] sm:$0xff] %v33_v4  ;;  %v97_v15 = vadd.f32 -2.0, %v43_v9  ;;  %v98_v16 = vadd.f32 -2.0, %v44_v10 }
   0xc   :  { %40 = vst [vmem:[#allocation5 + $0x28] sm:$0xff] %v34_v5  ;;  %v99_v17 = vadd.f32 -2.0, %v45_v11  ;;  %v100_v19 = vadd.f32 -2.0, %v46_v12 }
   0xd   :  { %41 = vst [vmem:[#allocation5 + $0x30] sm:$0xff] %v35_v6  ;;  %v57_v21 = vmul.f32 %v97_v15, %v33_v4  ;;  %v58_v22 = vmul.f32 %v98_v16, %v34_v5 }
   0xe   :  { %42 = vst [vmem:[#allocation5 + $0x38] sm:$0xff] %v36_v8  ;;  %v59_v23 = vmul.f32 %v99_v17, %v35_v6  ;;  %v60_v24 = vmul.f32 %v100_v19, %v36_v8 }
   0xf   :  { %53 = vst [vmem:[#allocation5 + $0x40] sm:$0xff] %v97_v15  ;;  %v65_v25 = vsub.f32 %v57_v21, %v61_v13  ;;  %v66_v26 = vsub.f32 %v58_v22, %v62_v14 }
  0x10   :  { %54 = vst [vmem:[#allocation5 + $0x48] sm:$0xff] %v98_v16  ;;  %v67_v27 = vsub.f32 %v59_v23, %v63_v18  ;;  %v68_v28 = vsub.f32 %v60_v24, %v64_v20 }
  0x11   :  { %55 = vst [vmem:[#allocation5 + $0x50] sm:$0xff] %v99_v17 }
  0x12   :  { %56 = vst [vmem:[#allocation5 + $0x58] sm:$0xff] %v100_v19 }
  0x13   :  { %71 = vst [vmem:[#allocation5 + $0x60] sm:$0xff] %v65_v25 }
  0x14   :  { %72 = vst [vmem:[#allocation5 + $0x68] sm:$0xff] %v66_v26 }
  0x15   :  { %73 = vst [vmem:[#allocation5 + $0x70] sm:$0xff] %v67_v27 }
  0x16   :  { %74 = vst [vmem:[#allocation5 + $0x78] sm:$0xff] %v68_v28 }
  0x17   :  { %87 = dma.vmem_to_hbm [thread:$0]  %s80_s13, 2048, %s82_s16, [#allocation4], %s159_s11, %s159_s11, %s160_s12  }
  0x18   :  { %156 = dma.done.wait [#allocation4], 2048  }
  0x19   :  { %157 = vsyncadd [#allocation4], 4294965248 }
  0x1a   :  { %92 = vsyncpa [#allocation3], 1 }
  0x1b   :  { %93 = vsyncpa [#allocation4], 1 }

</bundles_post_ra>
